<compile_context>
chip_gen: v7x
topology: tpu7x:2x2x1
jax: 0.10.0
libtpu: 0.0.40
codegen_flags: <defaults>
</compile_context>

<pallas_src>
import functools

import jax
import jax.numpy as jnp
from jax.experimental import pallas as pl
from jax.experimental.pallas import tpu as pltpu


def channel_attention_kernel(x_ref, w1t_ref, w2t_ref, o_ref, sum_acc, max_acc,
                             *, hw_total, inv_hw, mask_hw):
    # x_ref: (TN, C, THW) native dtype    w1t_ref: (C, Cr)    w2t_ref: (Cr, C)
    # o_ref: (TN, C)                      sum_acc/max_acc: (TN, C, LW) f32 scratch
    hw_id = pl.program_id(1)
    n_hw = pl.num_programs(1)

    @pl.when(hw_id == 0)
    def _init():
        sum_acc[...] = jnp.zeros_like(sum_acc)
        max_acc[...] = jnp.full(max_acc.shape, -jnp.inf, dtype=max_acc.dtype)

    thw = x_ref.shape[-1]
    lw = sum_acc.shape[-1]          # accumulator lane width (<= 128)
    n_chunks = thw // lw            # exact by construction in the wrapper
    base = hw_id * thw

    # Hot loop: 1 vld + 2 VALU ops per vreg; no cross-lane (XLU) work until epilogue.
    for j in range(n_chunks):
        chunk = x_ref[:, :, pl.ds(j * lw, lw)].astype(jnp.float32)   # (TN, C, LW)
        if mask_hw:
            lane = jax.lax.broadcasted_iota(jnp.int32, chunk.shape, 2)
            valid = (base + j * lw + lane) < hw_total
            s_c = jnp.where(valid, chunk, 0.0)
            m_c = jnp.where(valid, chunk, -jnp.inf)
        else:
            s_c = chunk
            m_c = chunk
        sum_acc[...] = sum_acc[...] + s_c
        max_acc[...] = jnp.maximum(max_acc[...], m_c)

    @pl.when(hw_id == n_hw - 1)
    def _epilogue():
        avg = jnp.sum(sum_acc[...], axis=-1) * inv_hw          # (TN, C)
        mx = jnp.max(max_acc[...], axis=-1)                    # (TN, C)
        w1t = w1t_ref[...].astype(jnp.float32)                 # (C, Cr)
        w2t = w2t_ref[...].astype(jnp.float32)                 # (Cr, C)
        tn = avg.shape[0]
        v = jnp.concatenate([avg, mx], axis=0)                 # fuse both branches
        h = jnp.maximum(jnp.dot(v, w1t, preferred_element_type=jnp.float32), 0.0)
        y = jnp.dot(h, w2t, preferred_element_type=jnp.float32)  # (2*TN, C)
        out = jax.nn.sigmoid(y[:tn] + y[tn:])
        o_ref[...] = out.astype(o_ref.dtype)


def channel_attention(x_nchw, w_fc1, w_fc2, *, block_hw=None):
    """x_nchw: (N, C, H, W); w_fc1: (C//r, C, 1, 1); w_fc2: (C, C//r, 1, 1)."""
    N, C, H, W = x_nchw.shape
    Cr = w_fc1.shape[0]
    HW = H * W
    dtype = x_nchw.dtype
    itemsize = jnp.dtype(dtype).itemsize

    x_flat = x_nchw.reshape(N, C, HW)     # (N, C, HW), HW lane-dense
    w1t = w_fc1.reshape(Cr, C).T          # (C, Cr)
    w2t = w_fc2.reshape(C, Cr).T          # (Cr, C)

    # Batch tile: (8,128) rule on the (TN, C) output block -> TN == N or multiple of 8.
    TN = N if N <= 8 else 8
    grid_n = pl.cdiv(N, TN)

    # HW tile: large multiple of 128 (or full HW when HW < 128).
    if block_hw is not None:
        THW = block_hw
    elif HW < 128:
        THW = HW
    else:
        budget = 4 * 1024 * 1024                                   # per-buffer budget
        max_thw = max(128, (budget // (TN * C * itemsize)) // 128 * 128)
        max_thw = min(max_thw, 2048)                               # bound loop unroll
        THW = min(max_thw, (HW // 128) * 128)
    grid_hw = pl.cdiv(HW, THW)
    mask_hw = (HW % THW) != 0
    LW = min(128, THW)
    assert THW % LW == 0

    kernel = functools.partial(
        channel_attention_kernel,
        hw_total=HW, inv_hw=1.0 / HW, mask_hw=mask_hw)

    out = pl.pallas_call(
        kernel,
        out_shape=jax.ShapeDtypeStruct((N, C), dtype),
        grid_spec=pltpu.PrefetchScalarGridSpec(
            num_scalar_prefetch=0,
            grid=(grid_n, grid_hw),                       # reduction (HW) axis last
            in_specs=[
                pl.BlockSpec((TN, C, THW), lambda i, j: (i, 0, j)),
                pl.BlockSpec((C, Cr), lambda i, j: (0, 0)),   # weights: constant block
                pl.BlockSpec((Cr, C), lambda i, j: (0, 0)),
            ],
            out_specs=pl.BlockSpec((TN, C), lambda i, j: (i, 0)),
            scratch_shapes=[
                pltpu.VMEM((TN, C, LW), jnp.float32),     # running per-lane sum
                pltpu.VMEM((TN, C, LW), jnp.float32),     # running per-lane max
            ],
        ),
        compiler_params=pltpu.CompilerParams(
            dimension_semantics=("parallel", "arbitrary"),   # 2-TC sharding on v7x
            vmem_limit_bytes=32 * 1024 * 1024,
        ),
    )(x_flat, w1t, w2t)

    return out.reshape(N, C, 1, 1)


def channel_attention_ref(x, w_fc1, w_fc2):
    """Pure-JAX reference matching the PyTorch forward exactly."""
    w1 = w_fc1.reshape(w_fc1.shape[0], -1)   # (Cr, C)
    w2 = w_fc2.reshape(w_fc2.shape[0], -1)   # (C, Cr)
    avg = x.mean(axis=(2, 3))                # (N, C)
    mx = x.max(axis=(2, 3))                  # (N, C)

    def mlp(v):
        return jnp.maximum(v @ w1.T, 0.0) @ w2.T

    return jax.nn.sigmoid(mlp(avg) + mlp(mx)).reshape(x.shape[0], x.shape[1], 1, 1)


if __name__ == "__main__":
    key = jax.random.PRNGKey(0)
    kx, k1, k2, kx2 = jax.random.split(key, 4)

    # Shapes consistent with the module: in_planes=16, ratio=8 -> hidden=2.
    N, C, H, W = 2, 16, 16, 16
    ratio = 8
    Cr = C // ratio

    x = jax.random.normal(kx, (N, C, H, W), dtype=jnp.float32)
    w_fc1 = jax.random.normal(k1, (Cr, C, 1, 1), dtype=jnp.float32) * 0.1
    w_fc2 = jax.random.normal(k2, (C, Cr, 1, 1), dtype=jnp.float32) * 0.1

    out = jax.block_until_ready(channel_attention(x, w_fc1, w_fc2))
    ref = channel_attention_ref(x, w_fc1, w_fc2)
    assert out.shape == (N, C, 1, 1)
    assert jnp.allclose(out, ref, atol=1e-5, rtol=1e-5)

    # Second config: non-128-divisible spatial extent with forced HW tiling to
    # exercise the multi-step accumulation + partial-tile masking path.
    H2, W2 = 18, 18                           # HW = 324 -> 3 tiles of 128, masked
    x2 = jax.random.normal(kx2, (N, C, H2, W2), dtype=jnp.float32)
    out2 = jax.block_until_ready(channel_attention(x2, w_fc1, w_fc2, block_hw=128))
    ref2 = channel_attention_ref(x2, w_fc1, w_fc2)
    assert jnp.allclose(out2, ref2, atol=1e-5, rtol=1e-5)

    print("KERNEL_OK")
</pallas_src>

<mosaic_0001>
module attributes {stable_mosaic.version = 11 : i64} {
  func.func @channel_attention_kernel(%arg0: i32, %arg1: i32, %arg2: memref<2x16x256xf32, #tpu.memory_space<vmem>>, %arg3: memref<16x2xf32, #tpu.memory_space<vmem>>, %arg4: memref<2x16xf32, #tpu.memory_space<vmem>>, %arg5: memref<2x16xf32, #tpu.memory_space<vmem>>, %arg6: memref<2x16x128xf32, #tpu.memory_space<vmem>>, %arg7: memref<2x16x128xf32, #tpu.memory_space<vmem>>) attributes {dimension_semantics = [#tpu.dimension_semantics<parallel>, #tpu.dimension_semantics<arbitrary>], iteration_bounds = array<i64: 1, 1>, scalar_prefetch = 0 : i64, scratch_operands = 2 : i64, tpu.core_type = #tpu.core_type<tc>, window_params = [{transform_indices = @transform_0, window_bounds = array<i64: 2, 16, 256>}, {pipeline_mode = #tpu.pipeline_mode<synchronous>, transform_indices = @transform_1, window_bounds = array<i64: 16, 2>}, {pipeline_mode = #tpu.pipeline_mode<synchronous>, transform_indices = @transform_2, window_bounds = array<i64: 2, 16>}, {transform_indices = @transform_3, window_bounds = array<i64: 2, 16>}]} {
    %c0_i32 = arith.constant 0 : i32
    %0 = arith.cmpi eq, %arg1, %c0_i32 : i32
    %1 = arith.extui %0 : i1 to i32
    %c0_i32_0 = arith.constant 0 : i32
    %2 = arith.cmpi ne, %1, %c0_i32_0 : i32
    scf.if %2 {
      %cst = arith.constant 0.000000e+00 : f32
      %20 = vector.broadcast %cst : f32 to vector<2x16x128xf32>
      %c0_31 = arith.constant 0 : index
      %c0_32 = arith.constant 0 : index
      %c0_33 = arith.constant 0 : index
      %21 = vector.load %arg6[%c0_31, %c0_32, %c0_33] : memref<2x16x128xf32, #tpu.memory_space<vmem>>, vector<2x16x128xf32>
      tpu.vector_store %arg6[%c0_31, %c0_32, %c0_33], %20 {strides = array<i32>} : memref<2x16x128xf32, #tpu.memory_space<vmem>>, vector<2x16x128xf32>,
      %cst_34 = arith.constant 0xFF800000 : f32
      %22 = vector.broadcast %cst_34 : f32 to vector<2x16x128xf32>
      %c0_35 = arith.constant 0 : index
      %c0_36 = arith.constant 0 : index
      %c0_37 = arith.constant 0 : index
      %23 = vector.load %arg7[%c0_35, %c0_36, %c0_37] : memref<2x16x128xf32, #tpu.memory_space<vmem>>, vector<2x16x128xf32>
      tpu.vector_store %arg7[%c0_35, %c0_36, %c0_37], %22 {strides = array<i32>} : memref<2x16x128xf32, #tpu.memory_space<vmem>>, vector<2x16x128xf32>,
    } else {
    }
    %c0 = arith.constant 0 : index
    %c0_1 = arith.constant 0 : index
    %c0_2 = arith.constant 0 : index
    %3 = vector.load %arg2[%c0, %c0_1, %c0_2] : memref<2x16x256xf32, #tpu.memory_space<vmem>>, vector<2x16x128xf32>
    %c0_3 = arith.constant 0 : index
    %c0_4 = arith.constant 0 : index
    %c0_5 = arith.constant 0 : index
    %4 = vector.load %arg6[%c0_3, %c0_4, %c0_5] : memref<2x16x128xf32, #tpu.memory_space<vmem>>, vector<2x16x128xf32>
    %5 = arith.addf %4, %3 : vector<2x16x128xf32>
    %c0_6 = arith.constant 0 : index
    %c0_7 = arith.constant 0 : index
    %c0_8 = arith.constant 0 : index
    %6 = vector.load %arg6[%c0_6, %c0_7, %c0_8] : memref<2x16x128xf32, #tpu.memory_space<vmem>>, vector<2x16x128xf32>
    tpu.vector_store %arg6[%c0_6, %c0_7, %c0_8], %5 {strides = array<i32>} : memref<2x16x128xf32, #tpu.memory_space<vmem>>, vector<2x16x128xf32>,
    %c0_9 = arith.constant 0 : index
    %c0_10 = arith.constant 0 : index
    %c0_11 = arith.constant 0 : index
    %7 = vector.load %arg7[%c0_9, %c0_10, %c0_11] : memref<2x16x128xf32, #tpu.memory_space<vmem>>, vector<2x16x128xf32>
    %8 = arith.maximumf %7, %3 : vector<2x16x128xf32>
    %c0_12 = arith.constant 0 : index
    %c0_13 = arith.constant 0 : index
    %c0_14 = arith.constant 0 : index
    %9 = vector.load %arg7[%c0_12, %c0_13, %c0_14] : memref<2x16x128xf32, #tpu.memory_space<vmem>>, vector<2x16x128xf32>
    tpu.vector_store %arg7[%c0_12, %c0_13, %c0_14], %8 {strides = array<i32>} : memref<2x16x128xf32, #tpu.memory_space<vmem>>, vector<2x16x128xf32>,
    %c0_15 = arith.constant 0 : index
    %c0_16 = arith.constant 0 : index
    %c128 = arith.constant 128 : index
    %10 = vector.load %arg2[%c0_15, %c0_16, %c128] : memref<2x16x256xf32, #tpu.memory_space<vmem>>, vector<2x16x128xf32>
    %c0_17 = arith.constant 0 : index
    %c0_18 = arith.constant 0 : index
    %c0_19 = arith.constant 0 : index
    %11 = vector.load %arg6[%c0_17, %c0_18, %c0_19] : memref<2x16x128xf32, #tpu.memory_space<vmem>>, vector<2x16x128xf32>
    %12 = arith.addf %11, %10 : vector<2x16x128xf32>
    %c0_20 = arith.constant 0 : index
    %c0_21 = arith.constant 0 : index
    %c0_22 = arith.constant 0 : index
    %13 = vector.load %arg6[%c0_20, %c0_21, %c0_22] : memref<2x16x128xf32, #tpu.memory_space<vmem>>, vector<2x16x128xf32>
    tpu.vector_store %arg6[%c0_20, %c0_21, %c0_22], %12 {strides = array<i32>} : memref<2x16x128xf32, #tpu.memory_space<vmem>>, vector<2x16x128xf32>,
    %c0_23 = arith.constant 0 : index
    %c0_24 = arith.constant 0 : index
    %c0_25 = arith.constant 0 : index
    %14 = vector.load %arg7[%c0_23, %c0_24, %c0_25] : memref<2x16x128xf32, #tpu.memory_space<vmem>>, vector<2x16x128xf32>
    %15 = arith.maximumf %14, %10 : vector<2x16x128xf32>
    %c0_26 = arith.constant 0 : index
    %c0_27 = arith.constant 0 : index
    %c0_28 = arith.constant 0 : index
    %16 = vector.load %arg7[%c0_26, %c0_27, %c0_28] : memref<2x16x128xf32, #tpu.memory_space<vmem>>, vector<2x16x128xf32>
    tpu.vector_store %arg7[%c0_26, %c0_27, %c0_28], %15 {strides = array<i32>} : memref<2x16x128xf32, #tpu.memory_space<vmem>>, vector<2x16x128xf32>,
    %c0_i32_29 = arith.constant 0 : i32
    %17 = arith.cmpi eq, %arg1, %c0_i32_29 : i32
    %18 = arith.extui %17 : i1 to i32
    %c0_i32_30 = arith.constant 0 : i32
    %19 = arith.cmpi ne, %18, %c0_i32_30 : i32
    scf.if %19 {
      %c0_31 = arith.constant 0 : index
      %c0_32 = arith.constant 0 : index
      %c0_33 = arith.constant 0 : index
      %20 = vector.load %arg6[%c0_31, %c0_32, %c0_33] : memref<2x16x128xf32, #tpu.memory_space<vmem>>, vector<2x16x128xf32>
      %cst = arith.constant dense<0.000000e+00> : vector<2x16xf32>
      %21 = vector.multi_reduction <add>, %20, %cst [2] : vector<2x16x128xf32> to vector<2x16xf32>
      %cst_34 = arith.constant 3.906250e-03 : f32
      %22 = vector.broadcast %cst_34 : f32 to vector<2x16xf32>
      %23 = arith.mulf %21, %22 : vector<2x16xf32>
      %c0_35 = arith.constant 0 : index
      %c0_36 = arith.constant 0 : index
      %c0_37 = arith.constant 0 : index
      %24 = vector.load %arg7[%c0_35, %c0_36, %c0_37] : memref<2x16x128xf32, #tpu.memory_space<vmem>>, vector<2x16x128xf32>
      %cst_38 = arith.constant dense<0xFF800000> : vector<2x16xf32>
      %25 = vector.multi_reduction <maximumf>, %24, %cst_38 [2] : vector<2x16x128xf32> to vector<2x16xf32>
      %c0_39 = arith.constant 0 : index
      %c0_40 = arith.constant 0 : index
      %26 = vector.load %arg3[%c0_39, %c0_40] : memref<16x2xf32, #tpu.memory_space<vmem>>, vector<16x2xf32>
      %c0_41 = arith.constant 0 : index
      %c0_42 = arith.constant 0 : index
      %27 = vector.load %arg4[%c0_41, %c0_42] : memref<2x16xf32, #tpu.memory_space<vmem>>, vector<2x16xf32>
      %28 = tpu.concatenate %23, %25 in 0 : vector<2x16xf32>, vector<2x16xf32> -> vector<4x16xf32>
      %cst_43 = arith.constant dense<0.000000e+00> : vector<4x2xf32>
      %29 = tpu.matmul %28, %26, %cst_43 {dimension_numbers = #tpu.dot_dimension_numbers<[1], [0], [0], [1], [0, 0, 1, 1], [], []>} : vector<4x16xf32>, vector<16x2xf32>, vector<4x2xf32> -> vector<4x2xf32>
      %cst_44 = arith.constant 0.000000e+00 : f32
      %30 = vector.broadcast %cst_44 : f32 to vector<4x2xf32>
      %31 = arith.maximumf %29, %30 : vector<4x2xf32>
      %cst_45 = arith.constant dense<0.000000e+00> : vector<4x16xf32>
      %32 = tpu.matmul %31, %27, %cst_45 {dimension_numbers = #tpu.dot_dimension_numbers<[1], [0], [0], [1], [0, 0, 1, 1], [], []>} : vector<4x2xf32>, vector<2x16xf32>, vector<4x16xf32> -> vector<4x16xf32>
      %33 = vector.extract_strided_slice %32 {offsets = [0, 0], sizes = [2, 16], strides = [1, 1]} : vector<4x16xf32> to vector<2x16xf32>
      %34 = vector.extract_strided_slice %32 {offsets = [2, 0], sizes = [2, 16], strides = [1, 1]} : vector<4x16xf32> to vector<2x16xf32>
      %35 = arith.addf %33, %34 : vector<2x16xf32>
      %36 = arith.negf %35 : vector<2x16xf32>
      %37 = math.exp %36 : vector<2x16xf32>
      %cst_46 = arith.constant 1.000000e+00 : f32
      %38 = vector.broadcast %cst_46 : f32 to vector<2x16xf32>
      %39 = arith.addf %38, %37 : vector<2x16xf32>
      %40 = arith.divf %38, %39 : vector<2x16xf32>
      %c0_47 = arith.constant 0 : index
      %c0_48 = arith.constant 0 : index
      %41 = vector.load %arg5[%c0_47, %c0_48] : memref<2x16xf32, #tpu.memory_space<vmem>>, vector<2x16xf32>
      tpu.vector_store %arg5[%c0_47, %c0_48], %40 {strides = array<i32>} : memref<2x16xf32, #tpu.memory_space<vmem>>, vector<2x16xf32>,
    } else {
    }
    return
  }
  func.func @transform_0(%arg0: i32, %arg1: i32) -> (i32, i32, i32) {
    %c0_i32 = arith.constant 0 : i32
    %c0_i32_0 = arith.constant 0 : i32
    return %arg0, %c0_i32, %arg1 : i32, i32, i32
  }
  func.func @transform_1(%arg0: i32, %arg1: i32) -> (i32, i32) {
    %c0_i32 = arith.constant 0 : i32
    %c0_i32_0 = arith.constant 0 : i32
    %c0_i32_1 = arith.constant 0 : i32
    return %c0_i32, %c0_i32_0 : i32, i32
  }
  func.func @transform_2(%arg0: i32, %arg1: i32) -> (i32, i32) {
    %c0_i32 = arith.constant 0 : i32
    %c0_i32_0 = arith.constant 0 : i32
    %c0_i32_1 = arith.constant 0 : i32
    return %c0_i32, %c0_i32_0 : i32, i32
  }
  func.func @transform_3(%arg0: i32, %arg1: i32) -> (i32, i32) {
    %c0_i32 = arith.constant 0 : i32
    %c0_i32_0 = arith.constant 0 : i32
    return %arg0, %c0_i32 : i32, i32
  }
}

</mosaic_0001>

<bundles_post_ra>
// kernel: tpu_custom_call.1
= control target key start
LH: loop header
LB: loop body
LE: loop exit
PB: predicated region body
PF: predicated region fallthrough
CT: control target
= control target key end

     0   :  { %8 = vsyncpa [#allocation5], 0  ;;  %s509_s0 = inlined_call_operand.hbm [shape: f32[2,16,256], index: 0, kind: input, shape index: {}]   ;;  %s510_s1 = inlined_call_operand.vmem [shape: f32[16,2], index: 1, kind: input, shape index: {}]   ;;  %s511_s2 = inlined_call_operand.vmem [shape: f32[2,16], index: 2, kind: input, shape index: {}]   ;;  %s512_s3 = inlined_call_operand.hbm [shape: f32[2,16], index: 3, kind: output, shape index: {}]  }
   0x1   :  { %9 = vsyncpa [#allocation6], 0  ;;  %s449_s12 = smov [#allocation4]   ;;  %s401_s16 = scalar_lea.hbm %s509_s0, 1024 }
   0x2   :  { %s15_s13 = sshll.u32 %s449_s12, 4  ;;  %p402_p0 = scmp.ne.s32.totalorder %s509_s0, %s401_s16  ;;  %s16_s13 = int_to_ptr.vmem [resolvable:$true] %s15_s13 }
   0x3   :  { %p405_p1 = scmp.lt.u32.totalorder %s401_s16, %s509_s0 }
   0x5   :  { %p407_p2 = pnand %p405_p1, %p402_p0 }
   0x7   :  { %410 = shalt.err (!%p407_p2)
}
   0x8   :  { %s411_s21 = scalar_lea.vmem %s16_s13, 1024  ;;  %p416_p4 = scmp.lt.s32.totalorder %s16_s13, %s16_s13 }
   0x9   :  { %p412_p3 = scmp.ne.s32.totalorder %s16_s13, %s411_s21  ;;  %p417_p5 = scmp.lt.s32.totalorder %s411_s21, %s411_s21 }
   0xb   :  { %p418_p6 = por %p417_p5, %p416_p4 }
   0xd   :  { %p419_p7 = pnand %p418_p6, %p412_p3 }
   0xf   :  { %422 = shalt.err (!%p419_p7)
}
  0x10   :  { %s450_s22 = smov 256   ;;  %s451_s23 = smov 16  }
  0x11   :  { %21 = dma.hbm_to_vmem [thread:$0]  %s509_s0, 1024, %s16_s13, [#allocation5], %s450_s22, %s450_s22, %s451_s23  }
  0x12   :  { %445 = dma.done.wait [#allocation5], 1024  }
  0x13   :  { %446 = vsyncadd [#allocation5], 4294966272  ;;  %v43_v0 = vld [vmem:[#allocation4 + $0x20] sm:$0xff]  ;;  %v71_v1 = vld [vmem:[#allocation4 + $0x28] sm:$0xff]  ;;  %v452_v19 = vmov 0.0|0.0   ;;  %vm453_vm0 = vmmov 0   ;;  %v135_v21 = vlaneseq }
  0x14   :  { %v41_v2 = vld [vmem:[#allocation4] sm:$0xff]  ;;  %v79_v3 = vadd.f32 %v71_v1, %v43_v0  ;;  %v69_v4 = vld [vmem:[#allocation4 + $0x8] sm:$0xff]  ;;  %v44_v5 = vld [vmem:[#allocation4 + $0x30] sm:$0xff]  ;;  %v91_v15 = vmax.f32 %v43_v0, %v71_v1  ;;  %387 = vmatprep.subr.bf16.mxu0 %v452_v19  ;;  %v454_v20 = vmov 0.0   ;;  %vm146_vm1 = vcmask 130112   ;;  %s455_s30 = smov [#allocation7]  }
  0x15   :  { %v72_v6 = vld [vmem:[#allocation4 + $0x38] sm:$0xff]  ;;  %v77_v7 = vadd.f32 %v69_v4, %v41_v2  ;;  %v42_v8 = vld [vmem:[#allocation4 + $0x10] sm:$0xff]  ;;  %v89_v13 = vmax.f32 %v41_v2, %v69_v4  ;;  %v128_v16 = vld [vmem:[%s510_s1] sm:$0xff]  ;;  %379 = vmatprep.mubr.msk.f32.mxu0 %vm453_vm0, %v454_v20  ;;  %382 = vmatprep.subr.mxu1 %v454_v20  ;;  %v136_v22 = vand.u32 127, %v135_v21  ;;  %v138_v26 = vshrl.u32 %v135_v21, 7  ;;  %s357_s4 = sshll.u32 %s455_s30, 4  ;;  %s358_s4 = int_to_ptr.vmem [resolvable:$true] %s357_s4 }
  0x16   :  { %v70_v9 = vld [vmem:[#allocation4 + $0x18] sm:$0xff]  ;;  %108 = vadd.xlane.f32.xlu1 %v79_v3  ;;  %v80_v10 = vadd.f32 %v72_v6, %v44_v5  ;;  %v92_v14 = vmax.f32 %v44_v5, %v72_v6  ;;  %v129_v17 = vld [vmem:[%s510_s1 + $0x8] sm:$0xff]  ;;  %384 = vmatprep.mubr.msk.f32.mxu1 %vm453_vm0, %v454_v20  ;;  %vm157_vm2 = vcmask 1041409   ;;  %vm182_vm3 = vcmask 1043459   ;;  %v130_v54 = vld [vmem:[%s511_s2] sm:$0x3]  ;;  %p428_p9 = scmp.lt.s32.totalorder %s358_s4, %s358_s4 }
  0x17   :  { %104 = vadd.xlane.f32.xlu0 %v77_v7  ;;  %v78_v11 = vadd.f32 %v70_v9, %v42_v8  ;;  %v90_v12 = vmax.f32 %v42_v8, %v70_v9  ;;  %v388_v18 = vpack.c.bf16 %v129_v17, %v128_v16  ;;  %v141_v25 = vadd.s32 4294967288, %v136_v22  ;;  %s423_s2 = scalar_lea.vmem %s358_s4, 32 }
  0x18   :  { %v139_v32 = vsub.s32 %v136_v22, %v138_v26  ;;  %vm185_vm4 = vcmask 1041408   ;;  %vm187_vm5 = vcmask 130048   ;;  %vm262_vm6 = vcmask 15360   ;;  %p424_p8 = scmp.ne.s32.totalorder %s358_s4, %s423_s2  ;;  %p429_p10 = scmp.lt.s32.totalorder %s423_s2, %s423_s2 }
  0x19   :  { %389 = vmatpush3.bf16.msra.mxu0 %v388_v18  ;;  %v144_v29 = vsub.s32 %v141_v25, %v138_v26  ;;  %383 = vmatpush3.msk.msra.mxu1 %vm185_vm4, %v130_v54  ;;  %vm349_vm7 = vcmask 123904  }
  0x1a   :  { %110 = vadd.xlane.f32.xlu1 %v80_v10  ;;  %p430_p11 = por %p429_p10, %p428_p9 }
  0x1b   :  { %106 = vadd.xlane.f32.xlu0 %v78_v11 }
  0x1c   :  { %p431_p12 = pnand %p430_p11, %p424_p8 }
  0x1e   :  { %122 = vmax.xlane.f32.xlu1 %v90_v12 }
  0x1f   :  { %120 = vmax.xlane.f32.xlu0 %v89_v13 }
  0x22   :  { %126 = vmax.xlane.f32.xlu1 %v92_v14 }
  0x23   :  { %124 = vmax.xlane.f32.xlu0 %v91_v15 }
  0xa3   :  { %v109_v23 = vpop.xlane.xlu1 %108 }
  0xa4   :  { %v105_v24 = vpop.xlane.xlu0 %104  ;;  %v114_v33 = vmul.f32 0.00390625, %v109_v23 }
  0xa5   :  { %v112_v34 = vmul.f32 0.00390625, %v105_v24 }
  0xa6   :  { %v151_v39 = vrot.slane %v114_v33, %v139_v32 }
  0xa7   :  { %v111_v27 = vpop.xlane.xlu1 %110  ;;  %v140_v40 = vrot.slane %v112_v34, %v139_v32 }
  0xa8   :  { %v107_v28 = vpop.xlane.xlu0 %106  ;;  %v115_v30 = vmul.f32 0.00390625, %v111_v27 }
  0xa9   :  { %v113_v31 = vmul.f32 0.00390625, %v107_v28 }
  0xaa   :  { %v155_v37 = vrot.slane %v115_v30, %v144_v29 }
  0xab   :  { %v123_v35 = vpop.xlane.xlu1 %122  ;;  %v145_v38 = vrot.slane %v113_v31, %v144_v29 }
  0xac   :  { %v121_v36 = vpop.xlane.xlu0 %120  ;;  %v171_v41 = vrot.slane %v123_v35, %v144_v29  ;;  %v156_v46 = vsel %vm146_vm1, %v155_v37, %v151_v39 }
  0xad   :  { %v167_v42 = vrot.slane %v121_v36, %v139_v32  ;;  %v147_v47 = vsel %vm146_vm1, %v145_v38, %v140_v40 }
  0xae   :  { %v158_v51 = vsel %vm157_vm2, %v156_v46, %v147_v47 }
  0xaf   :  { %v127_v43 = vpop.xlane.xlu1 %126  ;;  %v172_v49 = vsel %vm146_vm1, %v171_v41, %v167_v42 }
  0xb0   :  { %v180_v44 = vrot.slane %v127_v43, %v144_v29  ;;  %v125_v45 = vpop.xlane.xlu0 %124 }
  0xb1   :  { %v176_v48 = vrot.slane %v125_v45, %v139_v32 }
  0xb3   :  { %v181_v50 = vsel %vm146_vm1, %v180_v44, %v176_v48 }
  0xb4   :  { %v183_v52 = vsel %vm182_vm3, %v181_v50, %v172_v49 }
  0xb5   :  { %v186_v53 = vsel %vm185_vm4, %v158_v51, %v183_v52 }
  0xb6   :  { %380 = vmatmul.mubr.msk.f32.vlgmr.msra.gmra.mrb[0].mxu0 %vm187_vm5, %v186_v53 }
 0x189   :  { %v257_v55 = vpop.f32.mrb[0].mxu0 }
 0x18a   :  { %v261_v56 = vmax.f32 %v257_v55, 0.0  ;;  %v381_v57 = vpop.f32.mrb[1].mxu0 }
 0x18c   :  { %385 = vmatmul.mubr.msk.f32.vlgmr.msra.gmra.mrb[0].mxu1 %vm262_vm6, %v261_v56 }
 0x25f   :  { %v335_v58 = vpop.f32.mrb[0].mxu1 }
 0x260   :  { %v340_v59 = vrot.slane %v335_v58, 2  ;;  %v386_v60 = vpop.f32.mrb[1].mxu1 }
 0x262   :  { %v342_v61 = vadd.f32 %v340_v59, %v335_v58 }
 0x264   :  { %v369_v62 = vmul.f32 -1.442695, %v342_v61 }
 0x266   :  { %397 = vpow2.f32 %v369_v62 }
 0x270   :  { %v398_v63 = vpop.eup %397 }
 0x271   :  { %v346_v0 = vadd.f32 1.0, %v398_v63 }
 0x273   :  { %399 = vrcp.f32 %v346_v0 }
 0x27d   :  { %v400_v1 = vpop.eup %399 }
 0x27e   :  { %350 = vst.msk [vmem:[#allocation7] sm:$0x3] %vm349_vm7, %v400_v1 }
 0x27f   :  { %434 = shalt.err (!%p431_p12)
}
 0x280   :  { %s435_s7 = scalar_lea.hbm %s512_s3, 32 }
 0x281   :  { %p436_p13 = scmp.ne.s32.totalorder %s512_s3, %s435_s7  ;;  %p439_p0 = scmp.lt.u32.totalorder %s435_s7, %s512_s3 }
 0x283   :  { %p441_p1 = pnand %p439_p0, %p436_p13 }
 0x285   :  { %444 = shalt.err (!%p441_p1)
}
 0x286   :  { %360 = dma.vmem_to_hbm [thread:$0]  %s358_s4, 32, %s512_s3, [#allocation6]  }
 0x287   :  { %447 = dma.done.wait [#allocation6], 32  }
 0x288   :  { %448 = vsyncadd [#allocation6], 4294967264 }
 0x289   :  { %364 = vsyncpa [#allocation5], 1 }
 0x28a   :  { %365 = vsyncpa [#allocation6], 1 }

</bundles_post_ra>
